<compile_context>
chip_gen: v7x
topology: tpu7x:2x2x1
jax: 0.10.0
libtpu: 0.0.40
codegen_flags: <defaults>
</compile_context>

<pallas_src>
import functools

import jax
import jax.numpy as jnp
from jax.experimental import pallas as pl
from jax.experimental.pallas import tpu as pltpu


def _conv_cols_kernel(x_ref, w_ref, b_ref, o_ref, col_ref, *, K, Cin, Wp, M):
    """One (batch, row-tile) step of the upsample conv (transposed im2col).

    x_ref  : (1, 1, Cin, (tH+K)*Wp)  halo'd, spatially-flattened input tile
    w_ref  : (Ct, K*K*Cin)           weight; rows = out channel, cols = (di, dj, cin)
    b_ref  : (Ct, 1)                 bias (f32)
    o_ref  : (1, 1, Ct, M)           conv output tile, M = tH*Wp (lane-dense)
    col_ref: (K*K*Cin, M)            VMEM scratch: transposed im2col matrix
    """
    # Build the im2col matrix: each tap writes a full lane-dense (Cin, M) row
    # block.  The (di, dj) shift is a static offset on the flattened minor axis
    # (row slide = di*Wp, column slide = dj), so no sublane relayouts occur.
    for di in range(K):
        for dj in range(K):
            t = di * K + dj
            col_ref[t * Cin:(t + 1) * Cin, :] = x_ref[0, 0, :, pl.ds(di * Wp + dj, M)]

    # Single MXU push per step; f32 accumulation.
    acc = jnp.dot(w_ref[...], col_ref[...], preferred_element_type=jnp.float32)
    o_ref[0, 0] = (acc + b_ref[...]).astype(o_ref.dtype)          # (Ct, M), lane-dense


def _pick_row_tile(N, H, need_bytes, budget):
    """Largest divisor of H whose per-step VMEM need fits `budget`.

    Only forces >= 2 row tiles when N == 1 (to give v7x's second TensorCore
    something to do); otherwise bigger tiles amortize the ~0.35us/step overhead.
    """
    divisors = [t for t in range(1, H + 1) if H % t == 0]
    fitting = [t for t in divisors if need_bytes(t) <= budget]
    if not fitting:
        raise ValueError(
            f"even a 1-row tile needs {need_bytes(1)} B > VMEM budget {budget} B; "
            "reduce W/Cin or raise the budget")
    tH = max(fitting)
    if N == 1 and tH == H and H > 1:
        smaller = [t for t in fitting if t < H]
        if smaller:
            tH = max(smaller)
    return tH


def pixel_shuffle_pack(x_nchw, weight_oihw, bias, *, scale_factor, upsample_kernel,
                       compute_dtype=jnp.float32):
    """Forward pass equivalent to the PyTorch PixelShufflePack module.

    x_nchw      : (N, Cin, H, W)
    weight_oihw : (Cout*scale^2, Cin, K, K)   (PyTorch Conv2d layout)
    bias        : (Cout*scale^2,)
    returns     : (N, Cout, H*scale, W*scale) NCHW, same as PyTorch

    compute_dtype=float32 (default) reproduces the module's f32 numerics;
    compute_dtype=bfloat16 is the explicit perf opt-in (f32 MXU accumulation).
    """
    N, Cin, H, W = x_nchw.shape
    K = upsample_kernel
    s = scale_factor
    Ct = weight_oihw.shape[0]                      # Cout * s * s
    Cout = Ct // (s * s)
    if K % 2 != 1:
        raise ValueError("upsample_kernel must be odd: pad=(K-1)//2 only keeps "
                         "the spatial size for odd kernels.")
    pad = (K - 1) // 2
    Wp = W + 2 * pad                               # padded width == matmul col stride
    out_dtype = x_nchw.dtype
    KKC = K * K * Cin
    cb = jax.dtypes.canonicalize_dtype(compute_dtype).itemsize
    ob = jax.dtypes.canonicalize_dtype(out_dtype).itemsize

    # ---- generation-aware VMEM budget (v5e/v6e: 128 MiB, v7x: 64 MiB) ----
    try:
        phys_vmem = int(pltpu.get_tpu_info().vmem_capacity_bytes)
    except Exception:                              # be conservative if the query fails
        phys_vmem = 64 << 20
    vmem_cap = int(0.55 * phys_vmem)               # scoped-limit ceiling
    tile_budget = min(vmem_cap // 2, 32 << 20)     # working-set target for tile sizing

    def need_bytes(tH):
        M = tH * Wp
        return (2 * Cin * (tH + K) * Wp * cb       # halo'd input block, double buffered
                + 2 * Ct * M * ob                  # output block, double buffered
                + KKC * M * cb                     # im2col scratch (single buffer)
                + 2 * (KKC * Ct * cb + Ct * 4)     # weights + bias
                + (1 << 20))                       # headroom

    tH = _pick_row_tile(N, H, need_bytes, tile_budget)
    nR = H // tH
    M = tH * Wp                                    # matmul M dim (incl. Wp-W junk cols)

    # ---- glue (one fused XLA copy of the small input): pad / halo-tile / cast ----
    # Extra zero row at the bottom: only read by the junk columns (w >= W) of the
    # last row tile's deepest tap; keeps every in-kernel slice in bounds.
    x_p = jnp.pad(x_nchw, ((0, 0), (0, 0), (pad, pad + 1), (pad, pad)))  # (N,Cin,H+K,Wp)
    tiles = [x_p[:, :, r * tH: r * tH + tH + K, :] for r in range(nR)]
    x_in = jnp.stack(tiles, axis=1).reshape(N, nR, Cin, (tH + K) * Wp)
    x_in = x_in.astype(compute_dtype)

    # weight: OIHW -> (Ct, K, K, Cin) -> (Ct, K*K*Cin); columns match col_ref rows.
    w2d = jnp.transpose(weight_oihw, (0, 2, 3, 1)).reshape(Ct, KKC).astype(compute_dtype)
    b2 = bias.reshape(Ct, 1).astype(jnp.float32)

    kernel = functools.partial(_conv_cols_kernel, K=K, Cin=Cin, Wp=Wp, M=M)

    vmem_limit = int(min(max(2 * need_bytes(tH), 8 << 20), vmem_cap))
    cost = pl.CostEstimate(
        flops=2 * N * nR * Ct * KKC * M,
        transcendentals=0,
        bytes_accessed=int(N * nR * Cin * (tH + K) * Wp * cb
                           + KKC * Ct * cb + Ct * 4
                           + N * nR * Ct * M * ob),
    )

    conv = pl.pallas_call(
        kernel,
        out_shape=jax.ShapeDtypeStruct((N, nR, Ct, M), out_dtype),
        grid_spec=pltpu.PrefetchScalarGridSpec(
            num_scalar_prefetch=0,
            grid=(N, nR),
            in_specs=[
                # per-row-tile halo'd input block: streams, O(tile) VMEM residency.
                pl.BlockSpec((1, 1, Cin, (tH + K) * Wp), lambda b, r: (b, r, 0, 0)),
                pl.BlockSpec((Ct, KKC), lambda b, r: (0, 0)),
                pl.BlockSpec((Ct, 1), lambda b, r: (0, 0)),
            ],
            out_specs=pl.BlockSpec((1, 1, Ct, M), lambda b, r: (b, r, 0, 0)),
            scratch_shapes=[pltpu.VMEM((KKC, M), compute_dtype)],
        ),
        compiler_params=pltpu.CompilerParams(
            dimension_semantics=("parallel", "parallel"),
            vmem_limit_bytes=vmem_limit,
        ),
        cost_estimate=cost,
    )(x_in, w2d, b2)

    # ---- glue: drop junk columns, un-tile, pixel_shuffle (pure layout, XLA) ----
    conv = conv.reshape(N, nR, Ct, tH, Wp)[:, :, :, :, :W]        # (N, nR, Ct, tH, W)
    conv = jnp.transpose(conv, (0, 2, 1, 3, 4)).reshape(N, Ct, H, W)
    # PyTorch pixel_shuffle: out[n, c, h*s+i, w*s+j] = conv[n, c*s*s + i*s + j, h, w]
    y = conv.reshape(N, Cout, s, s, H, W)
    y = jnp.transpose(y, (0, 1, 4, 2, 5, 3))                      # (N, Cout, H, s, W, s)
    return y.reshape(N, Cout, H * s, W * s)


def _reference(x_nchw, weight_oihw, bias, *, scale_factor, upsample_kernel):
    """Pure-JAX (XLA) f32 reference for correctness checking."""
    pad = (upsample_kernel - 1) // 2
    conv = jax.lax.conv_general_dilated(
        x_nchw, weight_oihw, window_strides=(1, 1),
        padding=((pad, pad), (pad, pad)),
        dimension_numbers=("NCHW", "OIHW", "NCHW"))
    conv = conv + bias.reshape(1, -1, 1, 1)
    N, Ct, H, W = conv.shape
    s = scale_factor
    Cout = Ct // (s * s)
    y = conv.reshape(N, Cout, s, s, H, W)
    y = jnp.transpose(y, (0, 1, 4, 2, 5, 3))
    return y.reshape(N, Cout, H * s, W * s)


if __name__ == "__main__":
    # module config (small, consistent with the PyTorch forward)
    in_channels = 4
    out_channels = 4
    scale_factor = 2
    upsample_kernel = 3

    key = jax.random.PRNGKey(0)
    kx, kw, kb = jax.random.split(key, 3)

    # input: NCHW, like the PyTorch module
    x = jax.random.normal(kx, (2, in_channels, 16, 16), dtype=jnp.float32)

    # deterministic synthetic Conv2d parameters (PyTorch OIHW weight layout)
    Ct = out_channels * scale_factor * scale_factor
    weight = jax.random.normal(
        kw, (Ct, in_channels, upsample_kernel, upsample_kernel),
        dtype=jnp.float32) * 0.1
    bias = jax.random.normal(kb, (Ct,), dtype=jnp.float32) * 0.1

    ref = jax.block_until_ready(
        _reference(x, weight, bias,
                   scale_factor=scale_factor, upsample_kernel=upsample_kernel))

    # default path: exact f32 numerics (matches the PyTorch module)
    out_f32 = jax.block_until_ready(pixel_shuffle_pack(
        x, weight, bias, scale_factor=scale_factor,
        upsample_kernel=upsample_kernel))
    assert out_f32.shape == (2, out_channels, 32, 32), out_f32.shape
    assert jnp.allclose(out_f32, ref, atol=1e-4, rtol=1e-4), \
        float(jnp.abs(out_f32 - ref).max())

    # explicit bf16-compute opt-in (perf path; f32 MXU accumulation)
    out_bf16 = jax.block_until_ready(pixel_shuffle_pack(
        x, weight, bias, scale_factor=scale_factor,
        upsample_kernel=upsample_kernel, compute_dtype=jnp.bfloat16))
    assert out_bf16.shape == (2, out_channels, 32, 32), out_bf16.shape
    assert jnp.allclose(out_bf16, ref, atol=5e-2, rtol=5e-2), \
        float(jnp.abs(out_bf16 - ref).max())

    print("KERNEL_OK")
</pallas_src>

<mosaic_0001>
module attributes {stable_mosaic.version = 11 : i64} {
  func.func @_conv_cols_kernel(%arg0: i32, %arg1: i32, %arg2: memref<1x1x4x342xf32, #tpu.memory_space<vmem>>, %arg3: memref<16x36xf32, #tpu.memory_space<vmem>>, %arg4: memref<16x1xf32, #tpu.memory_space<vmem>>, %arg5: memref<1x1x16x288xf32, #tpu.memory_space<vmem>>, %arg6: memref<36x288xf32, #tpu.memory_space<vmem>>) attributes {dimension_semantics = [#tpu.dimension_semantics<parallel>, #tpu.dimension_semantics<parallel>], iteration_bounds = array<i64: 2, 1>, scalar_prefetch = 0 : i64, scratch_operands = 1 : i64, tpu.core_type = #tpu.core_type<tc>, window_params = [{transform_indices = @transform_0, window_bounds = array<i64: 1, 1, 4, 342>}, {pipeline_mode = #tpu.pipeline_mode<synchronous>, transform_indices = @transform_1, window_bounds = array<i64: 16, 36>}, {pipeline_mode = #tpu.pipeline_mode<synchronous>, transform_indices = @transform_2, window_bounds = array<i64: 16, 1>}, {transform_indices = @transform_3, window_bounds = array<i64: 1, 1, 16, 288>}]} {
    %c0 = arith.constant 0 : index
    %c0_0 = arith.constant 0 : index
    %c0_1 = arith.constant 0 : index
    %c0_2 = arith.constant 0 : index
    %0 = vector.load %arg2[%c0, %c0_0, %c0_1, %c0_2] : memref<1x1x4x342xf32, #tpu.memory_space<vmem>>, vector<1x1x4x288xf32>
    %1 = vector.shape_cast %0 : vector<1x1x4x288xf32> to vector<4x288xf32>
    %c0_3 = arith.constant 0 : index
    %c0_4 = arith.constant 0 : index
    %2 = vector.load %arg6[%c0_3, %c0_4] : memref<36x288xf32, #tpu.memory_space<vmem>>, vector<4x288xf32>
    tpu.vector_store %arg6[%c0_3, %c0_4], %1 {strides = array<i32>} : memref<36x288xf32, #tpu.memory_space<vmem>>, vector<4x288xf32>,
    %c0_5 = arith.constant 0 : index
    %c0_6 = arith.constant 0 : index
    %c0_7 = arith.constant 0 : index
    %c1 = arith.constant 1 : index
    %3 = vector.load %arg2[%c0_5, %c0_6, %c0_7, %c1] : memref<1x1x4x342xf32, #tpu.memory_space<vmem>>, vector<1x1x4x288xf32>
    %4 = vector.shape_cast %3 : vector<1x1x4x288xf32> to vector<4x288xf32>
    %c4 = arith.constant 4 : index
    %c0_8 = arith.constant 0 : index
    %5 = vector.load %arg6[%c4, %c0_8] : memref<36x288xf32, #tpu.memory_space<vmem>>, vector<4x288xf32>
    tpu.vector_store %arg6[%c4, %c0_8], %4 {strides = array<i32>} : memref<36x288xf32, #tpu.memory_space<vmem>>, vector<4x288xf32>,
    %c0_9 = arith.constant 0 : index
    %c0_10 = arith.constant 0 : index
    %c0_11 = arith.constant 0 : index
    %c2 = arith.constant 2 : index
    %6 = vector.load %arg2[%c0_9, %c0_10, %c0_11, %c2] : memref<1x1x4x342xf32, #tpu.memory_space<vmem>>, vector<1x1x4x288xf32>
    %7 = vector.shape_cast %6 : vector<1x1x4x288xf32> to vector<4x288xf32>
    %c8 = arith.constant 8 : index
    %c0_12 = arith.constant 0 : index
    %8 = vector.load %arg6[%c8, %c0_12] : memref<36x288xf32, #tpu.memory_space<vmem>>, vector<4x288xf32>
    tpu.vector_store %arg6[%c8, %c0_12], %7 {strides = array<i32>} : memref<36x288xf32, #tpu.memory_space<vmem>>, vector<4x288xf32>,
    %c0_13 = arith.constant 0 : index
    %c0_14 = arith.constant 0 : index
    %c0_15 = arith.constant 0 : index
    %c18 = arith.constant 18 : index
    %9 = vector.load %arg2[%c0_13, %c0_14, %c0_15, %c18] : memref<1x1x4x342xf32, #tpu.memory_space<vmem>>, vector<1x1x4x288xf32>
    %10 = vector.shape_cast %9 : vector<1x1x4x288xf32> to vector<4x288xf32>
    %c12 = arith.constant 12 : index
    %c0_16 = arith.constant 0 : index
    %11 = vector.load %arg6[%c12, %c0_16] : memref<36x288xf32, #tpu.memory_space<vmem>>, vector<4x288xf32>
    tpu.vector_store %arg6[%c12, %c0_16], %10 {strides = array<i32>} : memref<36x288xf32, #tpu.memory_space<vmem>>, vector<4x288xf32>,
    %c0_17 = arith.constant 0 : index
    %c0_18 = arith.constant 0 : index
    %c0_19 = arith.constant 0 : index
    %c19 = arith.constant 19 : index
    %12 = vector.load %arg2[%c0_17, %c0_18, %c0_19, %c19] : memref<1x1x4x342xf32, #tpu.memory_space<vmem>>, vector<1x1x4x288xf32>
    %13 = vector.shape_cast %12 : vector<1x1x4x288xf32> to vector<4x288xf32>
    %c16 = arith.constant 16 : index
    %c0_20 = arith.constant 0 : index
    %14 = vector.load %arg6[%c16, %c0_20] : memref<36x288xf32, #tpu.memory_space<vmem>>, vector<4x288xf32>
    tpu.vector_store %arg6[%c16, %c0_20], %13 {strides = array<i32>} : memref<36x288xf32, #tpu.memory_space<vmem>>, vector<4x288xf32>,
    %c0_21 = arith.constant 0 : index
    %c0_22 = arith.constant 0 : index
    %c0_23 = arith.constant 0 : index
    %c20 = arith.constant 20 : index
    %15 = vector.load %arg2[%c0_21, %c0_22, %c0_23, %c20] : memref<1x1x4x342xf32, #tpu.memory_space<vmem>>, vector<1x1x4x288xf32>
    %16 = vector.shape_cast %15 : vector<1x1x4x288xf32> to vector<4x288xf32>
    %c20_24 = arith.constant 20 : index
    %c0_25 = arith.constant 0 : index
    %17 = vector.load %arg6[%c20_24, %c0_25] : memref<36x288xf32, #tpu.memory_space<vmem>>, vector<4x288xf32>
    tpu.vector_store %arg6[%c20_24, %c0_25], %16 {strides = array<i32>} : memref<36x288xf32, #tpu.memory_space<vmem>>, vector<4x288xf32>,
    %c0_26 = arith.constant 0 : index
    %c0_27 = arith.constant 0 : index
    %c0_28 = arith.constant 0 : index
    %c36 = arith.constant 36 : index
    %18 = vector.load %arg2[%c0_26, %c0_27, %c0_28, %c36] : memref<1x1x4x342xf32, #tpu.memory_space<vmem>>, vector<1x1x4x288xf32>
    %19 = vector.shape_cast %18 : vector<1x1x4x288xf32> to vector<4x288xf32>
    %c24 = arith.constant 24 : index
    %c0_29 = arith.constant 0 : index
    %20 = vector.load %arg6[%c24, %c0_29] : memref<36x288xf32, #tpu.memory_space<vmem>>, vector<4x288xf32>
    tpu.vector_store %arg6[%c24, %c0_29], %19 {strides = array<i32>} : memref<36x288xf32, #tpu.memory_space<vmem>>, vector<4x288xf32>,
    %c0_30 = arith.constant 0 : index
    %c0_31 = arith.constant 0 : index
    %c0_32 = arith.constant 0 : index
    %c37 = arith.constant 37 : index
    %21 = vector.load %arg2[%c0_30, %c0_31, %c0_32, %c37] : memref<1x1x4x342xf32, #tpu.memory_space<vmem>>, vector<1x1x4x288xf32>
    %22 = vector.shape_cast %21 : vector<1x1x4x288xf32> to vector<4x288xf32>
    %c28 = arith.constant 28 : index
    %c0_33 = arith.constant 0 : index
    %23 = vector.load %arg6[%c28, %c0_33] : memref<36x288xf32, #tpu.memory_space<vmem>>, vector<4x288xf32>
    tpu.vector_store %arg6[%c28, %c0_33], %22 {strides = array<i32>} : memref<36x288xf32, #tpu.memory_space<vmem>>, vector<4x288xf32>,
    %c0_34 = arith.constant 0 : index
    %c0_35 = arith.constant 0 : index
    %c0_36 = arith.constant 0 : index
    %c38 = arith.constant 38 : index
    %24 = vector.load %arg2[%c0_34, %c0_35, %c0_36, %c38] : memref<1x1x4x342xf32, #tpu.memory_space<vmem>>, vector<1x1x4x288xf32>
    %25 = vector.shape_cast %24 : vector<1x1x4x288xf32> to vector<4x288xf32>
    %c32 = arith.constant 32 : index
    %c0_37 = arith.constant 0 : index
    %26 = vector.load %arg6[%c32, %c0_37] : memref<36x288xf32, #tpu.memory_space<vmem>>, vector<4x288xf32>
    tpu.vector_store %arg6[%c32, %c0_37], %25 {strides = array<i32>} : memref<36x288xf32, #tpu.memory_space<vmem>>, vector<4x288xf32>,
    %c0_38 = arith.constant 0 : index
    %c0_39 = arith.constant 0 : index
    %27 = vector.load %arg3[%c0_38, %c0_39] : memref<16x36xf32, #tpu.memory_space<vmem>>, vector<16x36xf32>
    %c0_40 = arith.constant 0 : index
    %c0_41 = arith.constant 0 : index
    %28 = vector.load %arg6[%c0_40, %c0_41] : memref<36x288xf32, #tpu.memory_space<vmem>>, vector<36x288xf32>
    %cst = arith.constant dense<0.000000e+00> : vector<16x288xf32>
    %29 = tpu.matmul %27, %28, %cst {dimension_numbers = #tpu.dot_dimension_numbers<[1], [0], [0], [1], [0, 0, 1, 1], [], []>} : vector<16x36xf32>, vector<36x288xf32>, vector<16x288xf32> -> vector<16x288xf32>
    %c0_42 = arith.constant 0 : index
    %c0_43 = arith.constant 0 : index
    %30 = vector.load %arg4[%c0_42, %c0_43] : memref<16x1xf32, #tpu.memory_space<vmem>>, vector<16x1xf32>
    %31 = vector.broadcast %30 : vector<16x1xf32> to vector<16x288xf32>
    %32 = arith.addf %29, %31 : vector<16x288xf32>
    %c0_44 = arith.constant 0 : index
    %c0_45 = arith.constant 0 : index
    %c0_46 = arith.constant 0 : index
    %c0_47 = arith.constant 0 : index
    %33 = vector.load %arg5[%c0_44, %c0_45, %c0_46, %c0_47] : memref<1x1x16x288xf32, #tpu.memory_space<vmem>>, vector<1x1x16x288xf32>
    %34 = vector.shape_cast %33 : vector<1x1x16x288xf32> to vector<16x288xf32>
    %35 = vector.shape_cast %32 : vector<16x288xf32> to vector<1x1x16x288xf32>
    tpu.vector_store %arg5[%c0_44, %c0_45, %c0_46, %c0_47], %35 {strides = array<i32>} : memref<1x1x16x288xf32, #tpu.memory_space<vmem>>, vector<1x1x16x288xf32>,
    return
  }
  func.func @transform_0(%arg0: i32, %arg1: i32) -> (i32, i32, i32, i32) {
    %c0_i32 = arith.constant 0 : i32
    %c0_i32_0 = arith.constant 0 : i32
    %c0_i32_1 = arith.constant 0 : i32
    return %arg0, %arg1, %c0_i32, %c0_i32_0 : i32, i32, i32, i32
  }
  func.func @transform_1(%arg0: i32, %arg1: i32) -> (i32, i32) {
    %c0_i32 = arith.constant 0 : i32
    %c0_i32_0 = arith.constant 0 : i32
    %c0_i32_1 = arith.constant 0 : i32
    return %c0_i32, %c0_i32_0 : i32, i32
  }
  func.func @transform_2(%arg0: i32, %arg1: i32) -> (i32, i32) {
    %c0_i32 = arith.constant 0 : i32
    %c0_i32_0 = arith.constant 0 : i32
    %c0_i32_1 = arith.constant 0 : i32
    return %c0_i32, %c0_i32_0 : i32, i32
  }
  func.func @transform_3(%arg0: i32, %arg1: i32) -> (i32, i32, i32, i32) {
    %c0_i32 = arith.constant 0 : i32
    %c0_i32_0 = arith.constant 0 : i32
    %c0_i32_1 = arith.constant 0 : i32
    return %arg0, %arg1, %c0_i32, %c0_i32_0 : i32, i32, i32, i32
  }
}

</mosaic_0001>

<bundles_post_ra>
// kernel: tpu_custom_call.1
= control target key start
LH: loop header
LB: loop body
LE: loop exit
PB: predicated region body
PF: predicated region fallthrough
CT: control target
= control target key end

     0   :  { %8 = vsyncpa [#allocation4], 0  ;;  %s1202_s0 = inlined_call_operand.hbm [shape: f32[2,1,4,342], index: 0, kind: input, shape index: {}]   ;;  %s1203_s1 = inlined_call_operand.vmem [shape: f32[16,36], index: 1, kind: input, shape index: {}]   ;;  %s1204_s2 = inlined_call_operand.vmem [shape: f32[16,1], index: 2, kind: input, shape index: {}]   ;;  %s1205_s3 = inlined_call_operand.hbm [shape: f32[2,1,16,288], index: 3, kind: output, shape index: {}]  }
   0x1   :  { %10 = vsyncpa [#allocation4 + $0x1], 0 }
   0x2   :  { %11 = vsyncpa [#allocation5], 0 }
   0x3   :  { %13 = vsyncpa [#allocation5 + $0x1], 0  ;;  %s974_s12 = smov 0   ;;  %s976_s13 = smov 0  }
   0x4   :  { %s978_s14 = smov 0   ;;  %s980_s15 = smov 0  }
   0x5   :  { %s982_s16 = smov 0   ;;  %s984_s17 = smov 0  }
   0x6 LB: > { %s687_s18 = sadd.s32 4294967295, %s938_s17   ;;  %s688_s19 = sadd.s32 4294967294, %s938_s17   ;;  %s938_s17 = sphi %s984_s17, %s19_s17   ;;  %s934_s16 = sphi %s982_s16, %s1220_s16   ;;  %s930_s15 = sphi %s980_s15, %s1219_s15   ;;  %s926_s14 = sphi %s978_s14, %s1218_s14   ;;  %s922_s13 = sphi %s976_s13, %s1217_s13   ;;  %s918_s12 = sphi %s974_s12, %s1216_s12  }
   0x7   : > { %s31_s20 = sadd.s32 1, %s934_s16  ;;  %s40_s21 = sadd.s32 1, %s926_s14 }
   0x8   : > { %p33_p0 = scmp.ge.s32.totalorder %s31_s20, 2  ;;  %p47_p1 = scmp.ne.s32.totalorder %s926_s14, %s922_s13 }
   0x9   : > { %p48_p2 = scmp.eq.s32.totalorder %s938_s17, 0  ;;  %p53_p3 = scmp.ne.s32.totalorder %s922_s13, %s918_s12 }
   0xa   : > { %s1222_s20 = smov (%p33_p0, %s31_s20), 0  ;;  %p54_p5 = scmp.eq.s32.totalorder %s687_s18, 0 }
   0xb   : > { %p1015_p4 = por %p48_p2, %p47_p1  ;;  %s35_s23 = ssub.s32 %s934_s16, %s1222_s20 }
   0xc   : > { %p121_p6 = scmp.eq.s32.totalorder %s687_s18, 1  ;;  %p38_p7 = scmp.eq.s32.totalorder %s35_s23, 0 }
   0xd   : > { %p1021_p8 = por %p54_p5, %p53_p3  ;;  %p127_p10 = scmp.eq.s32.totalorder %s688_s19, 1 }
   0xe   : > { %p1025_p9 = por %p121_p6, %p47_p1  ;;  %p756_p13 = scmp.lt.s32.totalorder %s938_s17, 2 }
   0xf   : > { %s1030_s26 = scalar_select %p38_p7, %s926_s14, %s40_s21  }
  0x10   : > { %s1209_s25 = scalar_select %p1025_p9, 1, 0 }
  0x11   : > { %p1032_p11 = por %p127_p10, %p53_p3  ;;  %s153_s28 = sand.u32 1, %s926_s14  }
  0x12   : > { %s739_s29 = smul.u32 12, %s153_s28  ;;  %p1042_p0 = pnand %p756_p13, %p1015_p4 }
  0x13   : > { %s1210_s27 = scalar_select %p1032_p11, 1, 0 }
  0x14   : > { %s740_s30 = smul.u32 192, %s934_s16  ;;  %s157_s8 = scalar_lea.vmem [#allocation3], %s739_s29 }
  0x15   : > { %s167_s9 = sshll.u32 %s157_s8, 4  ;;  %s154_s10 = scalar_lea.sflag [#allocation4], %s153_s28  ;;  %s1052_s9 = int_to_ptr.vmem [resolvable:$true] %s167_s9 }
  0x16   : > { %s1050_s7 = scalar_lea.hbm %s1202_s0, %s740_s30  ;;  %p828_p3 = pneg %p1042_p0 }
  0x17   : > { %s826_s11 = scalar_lea.hbm %s1050_s7, 192  ;;  %s831_s21 = scalar_lea.hbm %s1202_s0, 384 }
  0x18   : > { %p827_p2 = scmp.ne.s32.totalorder %s1050_s7, %s826_s11  ;;  %p832_p6 = scmp.lt.u32.totalorder %s1050_s7, %s1202_s0 }
  0x19   : > { %p833_p7 = scmp.lt.u32.totalorder %s831_s21, %s826_s11  ;;  %p835_p13 = scmp.lt.u32.totalorder %s826_s11, %s1050_s7 }
  0x1a   : > { %p829_p4 = pnand %p828_p3, %p827_p2 }
  0x1b   : > { %p834_p10 = por %p833_p7, %p832_p6 }
  0x1c   : > { %p830_p5 = pneg %p829_p4 }
  0x1d   : > { %p836_p12 = por %p835_p13, %p834_p10 }
  0x1f   : > { %p837_p1 = pnand %p836_p12, %p830_p5 }
  0x21   : > { %840 = shalt.err (!%p837_p1)
}
  0x22   : > { %s841_s28 = scalar_lea.vmem %s1052_s9, 192  ;;  %s940_s29 = smov [#allocation3]  }
  0x23   : > { %p842_p2 = scmp.ne.s32.totalorder %s1052_s9, %s841_s28  ;;  %s846_s30 = sshll.u32 %s940_s29, 4  ;;  %s847_s30 = int_to_ptr.vmem [resolvable:$false] %s846_s30 }
  0x24   : > { %s848_s5 = scalar_lea.vmem %s847_s30, 384  ;;  %p849_p9 = scmp.lt.s32.totalorder %s1052_s9, %s847_s30 }
  0x25   : > { %p844_p4 = pnand %p842_p2, %p828_p3  ;;  %p850_p6 = scmp.lt.s32.totalorder %s848_s5, %s841_s28 }
  0x27   : > { %p845_p11 = pneg %p844_p4  ;;  %p851_p7 = por %p850_p6, %p849_p9 }
  0x29   : > { %p852_p10 = pnand %p851_p7, %p845_p11 }
  0x2b   : > { %855 = shalt.err (!%p852_p10)
}
  0x2c   : > { %751 = dma.hbm_to_vmem [thread:$0]  (!%p1042_p0), %s1050_s7, 192, %s1052_s9, %s154_s10  }
  0x2d   : > { %p172_p12 = scmp.lt.s32.totalorder %s938_s17, 3  ;;  %p1212_p1 = scmp.ge.s32.totalorder %s938_s17, 1 }
  0x2f   : > { %p173_p3 = pnand %p1212_p1, %p172_p12 }
  0x30   : > { %s1083_s6 = sand.u32 (!%p173_p3), 1, %s922_s13  }
  0x31   : > { %176 = sbr.rel (%p173_p3) target bundleno = 463 (0x1cf), region = 32  ;;  %s179_s11 = scalar_lea.sflag (!%p173_p3), [#allocation4], %s1083_s6 }
  0x32   : > { %s741_s8 = smul.u32 (!%p173_p3), 12, %s1083_s6 }
  0x34   : > { %s1087_s18 = scalar_lea.vmem (!%p173_p3), [#allocation3], %s741_s8 }
  0x38   : > { %909 = dma.done.wait (%p1021_p8), %s179_s11, 192  }
  0x39   : > { %911 = vsyncadd (%p1021_p8), %s179_s11, 4294967104  ;;  %v237_v0 = vld [vmem:[%s1087_s18 + $0x8] sm:$0xf]  ;;  %v214_v1 = vld [vmem:[%s1087_s18] sm:$0xff]  ;;  %s941_s4 = smov 126   ;;  %s942_s7 = smov 127  }
  0x3a   : > { %245 = vrot.lane.b32.xlu1 %v237_v0, %s941_s4  ;;  %222 = vrot.lane.b32.xlu0 %v214_v1, %s942_s7  ;;  %v240_v2 = vcombine.high %v214_v1, %v214_v1  ;;  %210 = vst [vmem:[#allocation2] sm:$0xf] %v214_v1  ;;  %vm212_vm0 = vcmask 257024   ;;  %v206_v3 = vld [vmem:[%s1087_s18 + $0x8] sm:$0xf]  ;;  %s943_s24 = smov 110   ;;  %v218_v6 = vcombine.low %v214_v1, %v214_v1 }
  0x3b   : > { %v822_v4 = vld [vmem:[%s1087_s18 + $0x8] ss:$0 sps:$4 sm:$0xff]   ;;  %213 = vst.msk [vmem:[#allocation2 + $0x10] sm:$0xf] %vm212_vm0, %v206_v3  ;;  %s944_s9 = smov 109   ;;  %s945_s10 = smov 108  }
  0x3c   : > { %211 = vst [vmem:[#allocation2 + $0x8] sm:$0xf] %v240_v2  ;;  %v823_v5 = vld [vmem:[%s1087_s18 + $0x8] ss:$0 sps:$4 sm:$0xff]   ;;  %s946_s19 = smov 92   ;;  %s947_s21 = smov 91  }
  0x3d   : > { %v278_v7 = vld [vmem:[%s1087_s18 + $0x8] sm:$0xf]  ;;  %s948_s22 = smov 90   ;;  %v949_v12 = vmov 0.0   ;;  %vm408_vm1 = vcmask 293888   ;;  %v950_v16 = vmov 0  }
  0x3e   : > { %243 = vrot.lane.b32.xlu1 %v240_v2, %s941_s4  ;;  %264 = vrot.lane.b32.xlu0 %v214_v1, %s943_s24  ;;  %v824_v8 = vld [vmem:[%s1087_s18 + $0x8] ss:$0 sps:$4 sm:$0xff]   ;;  %vm247_vm2 = vcmask 1031168   ;;  %vm234_vm3 = vcmask 261124   ;;  %vm268_vm4 = vcmask 900096   ;;  %vm226_vm5 = vcmask 1039360  }
  0x3f   : > { %v319_v9 = vld [vmem:[%s1087_s18 + $0x8] sm:$0xf]  ;;  %489 = vmatprep.mubr.f32.mxu0 %v949_v12  ;;  %818 = vset.pattern.permute.xlu0 %v950_v16  ;;  %vm288_vm6 = vcmask 891904   ;;  %vm309_vm7 = vcmask 883712   ;;  %vm329_vm8 = vcmask 752640   ;;  %vm350_vm9 = vcmask 744448  }
  0x40   : > { %v825_v10 = vld [vmem:[%s1087_s18 + $0x8] ss:$0 sps:$4 sm:$0xff]   ;;  %819 = vset.pattern.permute.xlu1 %v950_v16  ;;  %vm370_vm10 = vcmask 736256   ;;  %vm415_vm11 = vcmask 1043456   ;;  %vm579_vm12 = vcmask 261120   ;;  %p1213_p9 = scmp.ne.s32.totalorder %s1209_s25, 0 }
  0x41   : > { %v360_v11 = vld [vmem:[%s1087_s18 + $0x8] sm:$0xf]  ;;  %s951_s23 = smov [#allocation6]  }
  0x42   : > { %266 = vrot.lane.b32.xlu1 %v822_v4, %s943_s24  ;;  %224 = vrot.lane.b32.xlu0 %v823_v5, %s942_s7  ;;  %v1108_v13 = vld [vmem:[%s1203_s1] sm:$0xff]  ;;  %v397_v15 = vld [vmem:[%s1204_s2 + $0x8] sm:$0xff]  ;;  %s860_s28 = sshll.u32 %s951_s23, 4  ;;  %s861_s28 = int_to_ptr.vmem [resolvable:$false] %s860_s28 }
  0x43   : > { %720 = vmatprep.mubr.msk.f32.mxu1 %vm408_vm1, %v1108_v13  ;;  %v396_v14 = vld [vmem:[%s1204_s2] sm:$0xff]  ;;  %s862_s29 = scalar_lea.vmem %s861_s28, 1536 }
  0x46   : > { %241 = vrot.lane.b32.xlu1 %v214_v1, %s941_s4  ;;  %220 = vrot.lane.b32.xlu0 %v218_v6, %s942_s7  ;;  %s742_s4 = smul.u32 48, %s1083_s6 }
  0x48   : > { %s204_s7 = scalar_lea.vmem [#allocation6], %s742_s4 }
  0x4a   : > { %284 = vrot.lane.b32.xlu1 %v240_v2, %s944_s9  ;;  %262 = vrot.lane.b32.xlu0 %v218_v6, %s943_s24  ;;  %s600_s24 = sshll.u32 %s204_s7, 4  ;;  %s1148_s24 = int_to_ptr.vmem [resolvable:$true] %s600_s24 }
  0x4b   : > { %p863_p5 = scmp.lt.s32.totalorder %s1148_s24, %s861_s28 }
  0x4e   : > { %305 = vrot.lane.b32.xlu1 %v214_v1, %s945_s10  ;;  %286 = vrot.lane.b32.xlu0 %v278_v7, %s944_s9 }
  0x52   : > { %325 = vrot.lane.b32.xlu1 %v240_v2, %s946_s19  ;;  %307 = vrot.lane.b32.xlu0 %v824_v8, %s945_s10 }
  0x56   : > { %346 = vrot.lane.b32.xlu1 %v214_v1, %s947_s21  ;;  %327 = vrot.lane.b32.xlu0 %v319_v9, %s946_s19 }
  0x5a   : > { %282 = vrot.lane.b32.xlu1 %v214_v1, %s944_s9  ;;  %348 = vrot.lane.b32.xlu0 %v825_v10, %s947_s21  ;;  %s743_s9 = smul.u32 768, %s930_s15  ;;  %s585_s15 = scalar_lea.sflag [#allocation5], %s1083_s6 }
  0x5e   : > { %323 = vrot.lane.b32.xlu1 %v214_v1, %s946_s19  ;;  %303 = vrot.lane.b32.xlu0 %v218_v6, %s945_s10 }
  0x62   : > { %366 = vrot.lane.b32.xlu1 %v240_v2, %s948_s22  ;;  %344 = vrot.lane.b32.xlu0 %v218_v6, %s947_s21  ;;  %s1153_s21 = scalar_lea.hbm %s1205_s3, %s743_s9 }
  0x66   : > { %364 = vrot.lane.b32.xlu1 %v214_v1, %s948_s22  ;;  %368 = vrot.lane.b32.xlu0 %v360_v11, %s948_s22  ;;  %s856_s22 = scalar_lea.vmem %s1148_s24, 768 }
  0x67   : > { %p857_p8 = scmp.ne.s32.totalorder %s1148_s24, %s856_s22  ;;  %p864_p13 = scmp.lt.s32.totalorder %s862_s29, %s856_s22 }
  0x69   : > { %p858_p11 = pnand %p857_p8, %p1213_p9  ;;  %p865_p2 = por %p864_p13, %p863_p5 }
  0x6a   : > { %400 = vperm.xlu0 %818, %v396_v14   ;;  %405 = vperm.xlu1 %819, %v397_v15   ;;  %v380_v14 = vld [vmem:[%s1203_s1 + $0x8] sm:$0xff] }
  0x6b   : > { %p859_p0 = pneg %p858_p11 }
  0x6d   : > { %p866_p4 = pnand %p865_p2, %p859_p0 }
  0xac   : > { %v246_v17 = vpop.permute.xlu1 %245  ;;  %v223_v18 = vpop.permute.xlu0 %222 }
  0xad   : > { %255 = vst.msk [vmem:[#allocation2 + $0x28] sm:$0xf] %vm212_vm0, %v246_v17 }
  0xb0   : > { %v244_v19 = vpop.permute.xlu1 %243  ;;  %v265_v20 = vpop.permute.xlu0 %264 }
  0xb1   : > { %v249_v21 = vsel %vm247_vm2, %v244_v19, %v246_v17 }
  0xb2   : > { %254 = vst [vmem:[#allocation2 + $0x20] sm:$0xf] %v249_v21 }
  0xb4   : > { %v267_v22 = vpop.permute.xlu1 %266  ;;  %v225_v23 = vpop.permute.xlu0 %224 }
  0xb5   : > { %v270_v24 = vsel %vm268_vm4, %v265_v20, %v267_v22  ;;  %276 = vst.msk [vmem:[#allocation2 + $0x28] sm:$0xf0] %vm234_vm3, %v267_v22  ;;  %v228_v25 = vsel %vm226_vm5, %v223_v18, %v225_v23  ;;  %235 = vst.msk [vmem:[#allocation2 + $0x10] sm:$0xf0] %vm234_vm3, %v225_v23 }
  0xb6   : > { %275 = vst [vmem:[#allocation2 + $0x20] sm:$0xf0] %v270_v24  ;;  %233 = vst [vmem:[#allocation2 + $0x8] sm:$0xf0] %v228_v25 }
  0xb8   : > { %v242_v26 = vpop.permute.xlu1 %241  ;;  %v221_v27 = vpop.permute.xlu0 %220 }
  0xb9   : > { %v248_v28 = vsel %vm247_vm2, %v242_v26, %v244_v19  ;;  %v227_v29 = vsel %vm226_vm5, %v221_v27, %v223_v18 }
  0xba   : > { %253 = vst [vmem:[#allocation2 + $0x18] sm:$0xf] %v248_v28  ;;  %232 = vst [vmem:[#allocation2] sm:$0xf0] %v227_v29 }
  0xbc   : > { %v285_v30 = vpop.permute.xlu1 %284  ;;  %v263_v31 = vpop.permute.xlu0 %262  ;;  %v383_v32 = vld [vmem:[#allocation2 + $0x10] sm:$0xff]  ;;  %v386_v33 = vld [vmem:[#allocation2 + $0x28] sm:$0xff] }
  0xbd   : > { %v269_v34 = vsel %vm268_vm4, %v263_v31, %v265_v20  ;;  %v731_v35 = vpack.c.bf16 %v386_v33, %v383_v32  ;;  %v382_v36 = vld [vmem:[#allocation2 + $0x8] sm:$0xff]  ;;  %v385_v37 = vld [vmem:[#allocation2 + $0x20] sm:$0xff] }
  0xbe   : > { %274 = vst [vmem:[#allocation2 + $0x18] sm:$0xf0] %v269_v34  ;;  %v723_v38 = vpack.c.bf16 %v385_v37, %v382_v36 }
  0xbf   : > { %732 = vmatprep.subr.bf16.mxu1 %v731_v35 }
  0xc0   : > { %v306_v39 = vpop.permute.xlu1 %305  ;;  %v287_v40 = vpop.permute.xlu0 %286  ;;  %724 = vmatprep.subr.bf16.mxu0 %v723_v38  ;;  %734 = vmatpush3.bf16.msra.mxu1 %v731_v35 }
  0xc1   : > { %v290_v41 = vsel %vm288_vm6, %v285_v30, %v287_v40  ;;  %296 = vst.msk [vmem:[#allocation2 + $0x40] sm:$0xf] %vm212_vm0, %v287_v40  ;;  %v381_v45 = vld [vmem:[#allocation2] sm:$0xff] }
  0xc2   : > { %295 = vst [vmem:[#allocation2 + $0x38] sm:$0xf] %v290_v41 }
  0xc4   : > { %v326_v42 = vpop.permute.xlu1 %325  ;;  %v308_v43 = vpop.permute.xlu0 %307 }
  0xc5   : > { %v311_v44 = vsel %vm309_vm7, %v306_v39, %v308_v43  ;;  %317 = vst.msk [vmem:[#allocation2 + $0x40] sm:$0xf0] %vm234_vm3, %v308_v43  ;;  %v384_v46 = vld [vmem:[#allocation2 + $0x18] sm:$0xff] }
  0xc6   : > { %316 = vst [vmem:[#allocation2 + $0x38] sm:$0xf0] %v311_v44  ;;  %v725_v47 = vpack.c.bf16 %v384_v46, %v381_v45 }
  0xc8   : > { %v347_v48 = vpop.permute.xlu1 %346  ;;  %v328_v49 = vpop.permute.xlu0 %327  ;;  %726 = vmatpush1.bf16.msra.mxu0 %v725_v47 }
  0xc9   : > { %v331_v50 = vsel %vm329_vm8, %v326_v42, %v328_v49  ;;  %337 = vst.msk [vmem:[#allocation2 + $0x58] sm:$0xf] %vm212_vm0, %v328_v49 }
  0xca   : > { %336 = vst [vmem:[#allocation2 + $0x50] sm:$0xf] %v331_v50 }
  0xcc   : > { %v283_v51 = vpop.permute.xlu1 %282  ;;  %v349_v52 = vpop.permute.xlu0 %348  ;;  %v389_v61 = vld [vmem:[#allocation2 + $0x40] sm:$0xff] }
  0xcd   : > { %v289_v53 = vsel %vm288_vm6, %v283_v51, %v285_v30  ;;  %v352_v54 = vsel %vm350_vm9, %v347_v48, %v349_v52  ;;  %358 = vst.msk [vmem:[#allocation2 + $0x58] sm:$0xf0] %vm234_vm3, %v349_v52  ;;  %v388_v1 = vld [vmem:[#allocation2 + $0x38] sm:$0xff] }
  0xce   : > { %294 = vst [vmem:[#allocation2 + $0x30] sm:$0xf] %v289_v53  ;;  %357 = vst [vmem:[#allocation2 + $0x50] sm:$0xf0] %v352_v54 }
  0xd0   : > { %v324_v55 = vpop.permute.xlu1 %323  ;;  %v304_v56 = vpop.permute.xlu0 %303 }
  0xd1   : > { %v330_v57 = vsel %vm329_vm8, %v324_v55, %v326_v42  ;;  %v310_v58 = vsel %vm309_vm7, %v304_v56, %v306_v39 }
  0xd2   : > { %335 = vst [vmem:[#allocation2 + $0x48] sm:$0xf] %v330_v57  ;;  %315 = vst [vmem:[#allocation2 + $0x30] sm:$0xf0] %v310_v58 }
  0xd4   : > { %v367_v59 = vpop.permute.xlu1 %366  ;;  %v345_v60 = vpop.permute.xlu0 %344  ;;  %v392_v62 = vld [vmem:[#allocation2 + $0x58] sm:$0xff] }
  0xd5   : > { %v351_v63 = vsel %vm350_vm9, %v345_v60, %v347_v48  ;;  %v735_v0 = vpack.c.bf16 %v392_v62, %v389_v61  ;;  %v391_v2 = vld [vmem:[#allocation2 + $0x50] sm:$0xff] }
  0xd6   : > { %356 = vst [vmem:[#allocation2 + $0x48] sm:$0xf0] %v351_v63  ;;  %v727_v3 = vpack.c.bf16 %v391_v2, %v388_v1 }
  0xd7   : > { %736 = vmatprep.subr.bf16.mxu1 %v735_v0 }
  0xd8   : > { %v365_v4 = vpop.permute.xlu1 %364  ;;  %v369_v5 = vpop.permute.xlu0 %368  ;;  %728 = vmatprep.subr.bf16.mxu0 %v727_v3  ;;  %738 = vmatpush3.bf16.msra.mxu1 %v735_v0 }
  0xd9   : > { %v371_v6 = vsel %vm370_vm10, %v365_v4, %v367_v59  ;;  %v372_v7 = vsel %vm370_vm10, %v367_v59, %v369_v5  ;;  %378 = vst.msk [vmem:[#allocation2 + $0x70] sm:$0xf] %vm212_vm0, %v369_v5  ;;  %v387_v8 = vld [vmem:[#allocation2 + $0x30] sm:$0xff] }
  0xda   : > { %376 = vst [vmem:[#allocation2 + $0x60] sm:$0xf] %v371_v6  ;;  %377 = vst [vmem:[#allocation2 + $0x68] sm:$0xf] %v372_v7 }
  0xdd   : > { %v390_v9 = vld [vmem:[#allocation2 + $0x48] sm:$0xff] }
  0xde   : > { %v729_v10 = vpack.c.bf16 %v390_v9, %v387_v8 }
  0xe0   : > { %730 = vmatpush1.bf16.msra.mxu0 %v729_v10  ;;  %v395_v11 = vld [vmem:[#allocation2 + $0x70] sm:$0xf] }
  0xe1   : > { %718 = vmatprep.subr.msk.mxu1 %vm415_vm11, %v395_v11  ;;  %v394_v15 = vld [vmem:[#allocation2 + $0x68] sm:$0xf]  ;;  %v393_v16 = vld [vmem:[#allocation2 + $0x60] sm:$0xf] }
  0xe2   : > { %693 = vmatprep.subr.msk.mxu0 %vm415_vm11, %v394_v15  ;;  %719 = vmatpush3.msk.msra.mxu1 %vm415_vm11, %v395_v11 }
  0xe3   : > { %721 = vmatmul.mubr.msk.f32.vlgmr.msra.gmra.mrb[0].mxu1 %vm408_vm1, %v380_v14 }
  0xe4   : > { %694 = vmatpush1.msk.msra.mxu0 %vm415_vm11, %v393_v16 }
  0xe5   : > { %695 = vmatmul.mubr.msk.f32.vlgmr.msra.gmra.mrb[0].mxu0 %vm408_vm1, %v1108_v13 }
  0xe6   : > { %495 = vmatprep.mubr.f32.mxu0 %v949_v12 }
  0xe9   : > { %696 = vmatmul.mubr.msk.f32.gmra.mrb[2].mxu0 %vm408_vm1, %v380_v14  ;;  %v406_v17 = vpop.permute.xlu1 %405  ;;  %v401_v18 = vpop.permute.xlu0 %400 }
 0x1b6   : > { %v722_v19 = vpop.f32.mrb[0].mxu1 }
 0x1b7   : > { %v574_v20 = vadd.f32 %v722_v19, %v406_v17  ;;  %v568_v21 = vpop.f32.mrb[1].mxu1 }
 0x1b8   : > { %v491_v22 = vpop.f32.mrb[0].mxu0  ;;  %v569_v23 = vadd.f32 %v568_v21, %v401_v18 }
 0x1b9   : > { %v492_v24 = vadd.f32 %v491_v22, %v401_v18  ;;  %v493_v25 = vpop.f32.mrb[1].mxu0  ;;  %583 = vst.msk [vmem:[%s204_s7 + $0x28] sm:$0xff] %vm579_vm12, %v574_v20 }
 0x1ba   : > { %v494_v12 = vadd.f32 %v493_v25, %v401_v18  ;;  %580 = vst.msk [vmem:[%s204_s7 + $0x10] sm:$0xff] %vm579_vm12, %v569_v23 }
 0x1bb   : > { %577 = vst [vmem:[%s204_s7] sm:$0xff] %v492_v24 }
 0x1bc   : > { %578 = vst [vmem:[%s204_s7 + $0x8] sm:$0xff] %v494_v12  ;;  %v497_v13 = vpop.f32.mrb[2].mxu0 }
 0x1bd   : > { %v498_v26 = vadd.f32 %v497_v13, %v406_v17  ;;  %v499_v27 = vpop.f32.mrb[3].mxu0 }
 0x1be   : > { %v500_v28 = vadd.f32 %v499_v27, %v406_v17 }
 0x1bf   : > { %581 = vst [vmem:[%s204_s7 + $0x18] sm:$0xff] %v498_v26 }
 0x1c0   : > { %582 = vst [vmem:[%s204_s7 + $0x20] sm:$0xff] %v500_v28 }
 0x1c1   : > { %869 = shalt.err (!%p866_p4)
}
 0x1c2   : > { %s870_s30 = scalar_lea.hbm %s1153_s21, 768  ;;  %s874_s11 = scalar_lea.hbm %s1205_s3, 1536 }
 0x1c3   : > { %p871_p6 = scmp.ne.s32.totalorder %s1153_s21, %s870_s30  ;;  %p875_p12 = scmp.lt.u32.totalorder %s1153_s21, %s1205_s3 }
 0x1c4   : > { %p876_p1 = scmp.lt.u32.totalorder %s874_s11, %s870_s30  ;;  %p878_p8 = scmp.lt.u32.totalorder %s870_s30, %s1153_s21 }
 0x1c5   : > { %p872_p7 = pnand %p871_p6, %p1213_p9 }
 0x1c6   : > { %p877_p3 = por %p876_p1, %p875_p12 }
 0x1c7   : > { %p873_p10 = pneg %p872_p7 }
 0x1c8   : > { %p879_p11 = por %p878_p8, %p877_p3 }
 0x1ca   : > { %p880_p0 = pnand %p879_p11, %p873_p10 }
 0x1cc   : > { %883 = shalt.err (!%p880_p0)
}
 0x1cd   : > { %s952_s7 = smov 384   ;;  %s953_s9 = smov 24  }
 0x1ce   : > { %746 = dma.vmem_to_hbm [thread:$0]  (%p1213_p9), %s1148_s24, 768, %s1153_s21, %s585_s15, %s952_s7, %s952_s7, %s953_s9  }
 0x1cf PF: > { %s615_s10 = sand.u32 1, %s918_s12   ;;  %p1214_p5 = scmp.ne.s32.totalorder %s1210_s27, 0 }
 0x1d0   : > { %p1215_p13 = scmp.ge.s32.totalorder %s938_s17, 2  ;;  %s616_s19 = scalar_lea.sflag [#allocation5], %s615_s10 }
 0x1d2   : > { %p753_p2 = pnand %p1215_p13, %p1214_p5 }
 0x1d4   : > { %913 = dma.done.wait (!%p753_p2), %s616_s19, 768  }
 0x1d5   : > { %915 = vsyncadd (!%p753_p2), %s616_s19, 4294966528  ;;  %s19_s17 = sadd.s32 1, %s938_s17   ;;  %s1216_s12 = smov %s922_s13 }
 0x1d6   : > { %p16_p4 = scmp.ge.s32.totalorder %s19_s17, 4   ;;  %s1217_s13 = smov %s926_s14 }
 0x1d7   : > { %s1218_s14 = smov %s1030_s26  ;;  %s1219_s15 = smov %s934_s16 }
 0x1d8   : > { %s1220_s16 = smov %s1222_s20  ;;  %18 = sbr.rel (!%p16_p4) target bundleno = 6 (0x6), region = 77 }
 0x1df   :  { %621 = vsyncpa [#allocation4], 1 }
 0x1e0   :  { %623 = vsyncpa [#allocation4 + $0x1], 1 }
 0x1e1   :  { %624 = vsyncpa [#allocation5], 1 }
 0x1e2   :  { %626 = vsyncpa [#allocation5 + $0x1], 1 }

</bundles_post_ra>
